<compile_context>
chip_gen: v7x
topology: tpu7x:2x2x1
jax: 0.10.0
libtpu: 0.0.40
codegen_flags: <defaults>
</compile_context>

<pallas_src>
import jax
import jax.numpy as jnp
import numpy as np
from jax.experimental import pallas as pl
from jax.experimental.pallas import tpu as pltpu

# Logical / padded layer sizes.
H1, H2 = 100, 500
H1_PAD, H2_PAD, OUT_PAD = 128, 512, 128
NUM_HEADS = 2


def _round_up(x, m):
    return ((x + m - 1) // m) * m


def _pad_to(x, shape):
    pads = [(0, t - s) for s, t in zip(x.shape, shape)]
    return jnp.pad(x, pads)


# ----------------------------------------------------------------------------
# Kernel
# ----------------------------------------------------------------------------
def double_critic_kernel(s_ref, a_ref, w1s_ref, w1a_ref, b1_ref,
                         w2_ref, b2_ref, w3_ref, b3_ref, q_ref):
    # One batch tile per grid step; weights are VMEM-resident across the grid.
    s = s_ref[...]                      # (TB, S)
    a = a_ref[...]                      # (TB, A)
    for h in range(NUM_HEADS):          # unrolled over the 2 Q heads
        h1 = (jnp.dot(s, w1s_ref[h], preferred_element_type=jnp.float32)
              + jnp.dot(a, w1a_ref[h], preferred_element_type=jnp.float32)
              + b1_ref[h])
        h1 = jnp.maximum(h1, 0.0)                                   # (TB, 128)
        h2 = jnp.dot(h1, w2_ref[h], preferred_element_type=jnp.float32) + b2_ref[h]
        h2 = jnp.maximum(h2, 0.0)                                   # (TB, 512)
        q = jnp.dot(h2, w3_ref[h], preferred_element_type=jnp.float32) + b3_ref[h]
        q_ref[h] = q.astype(q_ref.dtype)                            # (TB, 128)


# ----------------------------------------------------------------------------
# Wrapper
# ----------------------------------------------------------------------------
def double_critic_forward(state, action, padded_params, *, batch_tile=256):
    """state: (..., S), action: (..., A) -> (q1, q2), each (..., 1)."""
    w1s, w1a, b1, w2, b2, w3, b3 = padded_params
    S = state.shape[-1]
    A = action.shape[-1]
    lead = state.shape[:-1]
    bflat = int(np.prod(lead)) if lead else 1

    s2 = state.reshape(bflat, S).astype(jnp.float32)
    a2 = action.reshape(bflat, A).astype(jnp.float32)

    # Batch tile: multiple of 8 (f32 sublane). 256 keeps the v6e/v7x 256-wide
    # MXU full and is still fine on v5e; tiny batches shrink to one tile.
    tb = batch_tile if bflat >= batch_tile else max(8, _round_up(bflat, 8))
    bpad = _round_up(bflat, tb)
    if bpad != bflat:
        s2 = jnp.pad(s2, ((0, bpad - bflat), (0, 0)))
        a2 = jnp.pad(a2, ((0, bpad - bflat), (0, 0)))

    grid = (bpad // tb,)

    flops = NUM_HEADS * 2 * bpad * (
        S * H1_PAD + A * H1_PAD + H1_PAD * H2_PAD + H2_PAD * OUT_PAD)
    bytes_accessed = 4 * (s2.size + a2.size + w1s.size + w1a.size + b1.size
                          + w2.size + b2.size + w3.size + b3.size
                          + NUM_HEADS * bpad * OUT_PAD)

    const3 = lambda i: (0, 0, 0)   # weights: DMA once, stay VMEM-resident

    q_pad = pl.pallas_call(
        double_critic_kernel,
        out_shape=jax.ShapeDtypeStruct((NUM_HEADS, bpad, OUT_PAD), jnp.float32),
        grid=grid,
        in_specs=[
            pl.BlockSpec((tb, S), lambda i: (i, 0)),          # state tile
            pl.BlockSpec((tb, A), lambda i: (i, 0)),          # action tile
            pl.BlockSpec(w1s.shape, const3),
            pl.BlockSpec(w1a.shape, const3),
            pl.BlockSpec(b1.shape, const3),
            pl.BlockSpec(w2.shape, const3),
            pl.BlockSpec(b2.shape, const3),
            pl.BlockSpec(w3.shape, const3),
            pl.BlockSpec(b3.shape, const3),
        ],
        out_specs=pl.BlockSpec((NUM_HEADS, tb, OUT_PAD), lambda i: (0, i, 0)),
        compiler_params=pltpu.CompilerParams(
            dimension_semantics=("parallel",),
            vmem_limit_bytes=32 * 1024 * 1024,
        ),
        cost_estimate=pl.CostEstimate(
            flops=flops, transcendentals=0, bytes_accessed=bytes_accessed),
    )(s2, a2, w1s, w1a, b1, w2, b2, w3, b3)

    q1 = q_pad[0, :bflat, 0:1].reshape(lead + (1,))
    q2 = q_pad[1, :bflat, 0:1].reshape(lead + (1,))
    return q1, q2


# ----------------------------------------------------------------------------
# Parameter init (PyTorch nn.Linear default init, weights stored [in, out])
# ----------------------------------------------------------------------------
def init_linear(key, fan_in, fan_out):
    kw, kb = jax.random.split(key)
    bound = 1.0 / np.sqrt(fan_in)
    w = jax.random.uniform(kw, (fan_in, fan_out), jnp.float32, -bound, bound)
    b = jax.random.uniform(kb, (1, fan_out), jnp.float32, -bound, bound)
    return w, b


def init_double_critic_params(key, state_space, action_space):
    """Logical (unpadded) params for the two Q heads."""
    heads = []
    for k in jax.random.split(key, NUM_HEADS):
        k1, k2, k3 = jax.random.split(k, 3)
        w1, b1 = init_linear(k1, state_space + action_space, H1)
        w2, b2 = init_linear(k2, H1, H2)
        w3, b3 = init_linear(k3, H2, 1)
        heads.append((w1, b1, w2, b2, w3, b3))
    return heads


def pad_double_critic_params(logical, state_space, action_space):
    """Pre-pad to tile-aligned shapes and stack the two heads on axis 0."""
    w1s_l, w1a_l, b1_l, w2_l, b2_l, w3_l, b3_l = [], [], [], [], [], [], []
    for (w1, b1, w2, b2, w3, b3) in logical:
        w1s_l.append(_pad_to(w1[:state_space], (state_space, H1_PAD)))
        w1a_l.append(_pad_to(w1[state_space:], (action_space, H1_PAD)))
        b1_l.append(_pad_to(b1, (1, H1_PAD)))
        w2_l.append(_pad_to(w2, (H1_PAD, H2_PAD)))
        b2_l.append(_pad_to(b2, (1, H2_PAD)))
        w3_l.append(_pad_to(w3, (H2_PAD, OUT_PAD)))
        b3_l.append(_pad_to(b3, (1, OUT_PAD)))
    return tuple(jnp.stack(lst) for lst in
                 (w1s_l, w1a_l, b1_l, w2_l, b2_l, w3_l, b3_l))


# ----------------------------------------------------------------------------
# Demo / correctness check
# ----------------------------------------------------------------------------
if __name__ == "__main__":
    state_space = 8
    action_space = 4
    batch = 2
    seq = 3   # DoubleCritic.forward cats on dim=2 -> 3-D (batch, seq, feat)

    key = jax.random.PRNGKey(0)
    k_params, k_s, k_a = jax.random.split(key, 3)

    logical_params = init_double_critic_params(k_params, state_space, action_space)
    padded_params = pad_double_critic_params(logical_params, state_space, action_space)

    state = jax.random.normal(k_s, (batch, seq, state_space), jnp.float32)
    action = jax.random.normal(k_a, (batch, seq, action_space), jnp.float32)

    q1, q2 = double_critic_forward(state, action, padded_params)
    q1, q2 = jax.block_until_ready((q1, q2))

    # Pure-numpy (float64) reference matching the PyTorch module.
    x = np.concatenate(
        [np.asarray(state, np.float64), np.asarray(action, np.float64)], axis=2
    ).reshape(-1, state_space + action_space)
    for head_params, q in zip(logical_params, (q1, q2)):
        w1, b1, w2, b2, w3, b3 = (np.asarray(p, np.float64) for p in head_params)
        h = np.maximum(x @ w1 + b1, 0.0)
        h = np.maximum(h @ w2 + b2, 0.0)
        q_ref = (h @ w3 + b3).reshape(batch, seq, 1)
        np.testing.assert_allclose(np.asarray(q), q_ref, rtol=1e-4, atol=1e-4)

    print("KERNEL_OK")
</pallas_src>

<mosaic_0001>
module attributes {stable_mosaic.version = 11 : i64} {
  func.func @double_critic_kernel(%arg0: i32, %arg1: memref<8x8xf32, #tpu.memory_space<vmem>>, %arg2: memref<8x4xf32, #tpu.memory_space<vmem>>, %arg3: memref<2x8x128xf32, #tpu.memory_space<vmem>>, %arg4: memref<2x4x128xf32, #tpu.memory_space<vmem>>, %arg5: memref<2x1x128xf32, #tpu.memory_space<vmem>>, %arg6: memref<2x128x512xf32, #tpu.memory_space<vmem>>, %arg7: memref<2x1x512xf32, #tpu.memory_space<vmem>>, %arg8: memref<2x512x128xf32, #tpu.memory_space<vmem>>, %arg9: memref<2x1x128xf32, #tpu.memory_space<vmem>>, %arg10: memref<2x8x128xf32, #tpu.memory_space<vmem>>) attributes {dimension_semantics = [#tpu.dimension_semantics<parallel>], iteration_bounds = array<i64: 1>, scalar_prefetch = 0 : i64, scratch_operands = 0 : i64, tpu.core_type = #tpu.core_type<tc>, window_params = [{transform_indices = @transform_0, window_bounds = array<i64: 8, 8>}, {transform_indices = @transform_1, window_bounds = array<i64: 8, 4>}, {pipeline_mode = #tpu.pipeline_mode<synchronous>, transform_indices = @transform_2, window_bounds = array<i64: 2, 8, 128>}, {pipeline_mode = #tpu.pipeline_mode<synchronous>, transform_indices = @transform_3, window_bounds = array<i64: 2, 4, 128>}, {pipeline_mode = #tpu.pipeline_mode<synchronous>, transform_indices = @transform_4, window_bounds = array<i64: 2, 1, 128>}, {pipeline_mode = #tpu.pipeline_mode<synchronous>, transform_indices = @transform_5, window_bounds = array<i64: 2, 128, 512>}, {pipeline_mode = #tpu.pipeline_mode<synchronous>, transform_indices = @transform_6, window_bounds = array<i64: 2, 1, 512>}, {pipeline_mode = #tpu.pipeline_mode<synchronous>, transform_indices = @transform_7, window_bounds = array<i64: 2, 512, 128>}, {pipeline_mode = #tpu.pipeline_mode<synchronous>, transform_indices = @transform_8, window_bounds = array<i64: 2, 1, 128>}, {transform_indices = @transform_9, window_bounds = array<i64: 2, 8, 128>}]} {
    %c0 = arith.constant 0 : index
    %c0_0 = arith.constant 0 : index
    %0 = vector.load %arg1[%c0, %c0_0] : memref<8x8xf32, #tpu.memory_space<vmem>>, vector<8x8xf32>
    %c0_1 = arith.constant 0 : index
    %c0_2 = arith.constant 0 : index
    %1 = vector.load %arg2[%c0_1, %c0_2] : memref<8x4xf32, #tpu.memory_space<vmem>>, vector<8x4xf32>
    %c0_3 = arith.constant 0 : index
    %c0_4 = arith.constant 0 : index
    %c0_5 = arith.constant 0 : index
    %2 = vector.load %arg3[%c0_3, %c0_4, %c0_5] : memref<2x8x128xf32, #tpu.memory_space<vmem>>, vector<1x8x128xf32>
    %3 = vector.shape_cast %2 : vector<1x8x128xf32> to vector<8x128xf32>
    %cst = arith.constant dense<0.000000e+00> : vector<8x128xf32>
    %4 = tpu.matmul %0, %3, %cst {dimension_numbers = #tpu.dot_dimension_numbers<[1], [0], [0], [1], [0, 0, 1, 1], [], []>} : vector<8x8xf32>, vector<8x128xf32>, vector<8x128xf32> -> vector<8x128xf32>
    %c0_6 = arith.constant 0 : index
    %c0_7 = arith.constant 0 : index
    %c0_8 = arith.constant 0 : index
    %5 = vector.load %arg4[%c0_6, %c0_7, %c0_8] : memref<2x4x128xf32, #tpu.memory_space<vmem>>, vector<1x4x128xf32>
    %6 = vector.shape_cast %5 : vector<1x4x128xf32> to vector<4x128xf32>
    %cst_9 = arith.constant dense<0.000000e+00> : vector<8x128xf32>
    %7 = tpu.matmul %1, %6, %cst_9 {dimension_numbers = #tpu.dot_dimension_numbers<[1], [0], [0], [1], [0, 0, 1, 1], [], []>} : vector<8x4xf32>, vector<4x128xf32>, vector<8x128xf32> -> vector<8x128xf32>
    %8 = arith.addf %4, %7 : vector<8x128xf32>
    %c0_10 = arith.constant 0 : index
    %c0_11 = arith.constant 0 : index
    %c0_12 = arith.constant 0 : index
    %9 = vector.load %arg5[%c0_10, %c0_11, %c0_12] : memref<2x1x128xf32, #tpu.memory_space<vmem>>, vector<1x1x128xf32>
    %10 = vector.shape_cast %9 : vector<1x1x128xf32> to vector<1x128xf32>
    %11 = vector.broadcast %10 : vector<1x128xf32> to vector<8x128xf32>
    %12 = arith.addf %8, %11 : vector<8x128xf32>
    %cst_13 = arith.constant 0.000000e+00 : f32
    %13 = vector.broadcast %cst_13 : f32 to vector<8x128xf32>
    %14 = arith.maximumf %12, %13 : vector<8x128xf32>
    %c0_14 = arith.constant 0 : index
    %c0_15 = arith.constant 0 : index
    %c0_16 = arith.constant 0 : index
    %15 = vector.load %arg6[%c0_14, %c0_15, %c0_16] : memref<2x128x512xf32, #tpu.memory_space<vmem>>, vector<1x128x512xf32>
    %16 = vector.shape_cast %15 : vector<1x128x512xf32> to vector<128x512xf32>
    %cst_17 = arith.constant dense<0.000000e+00> : vector<8x512xf32>
    %17 = tpu.matmul %14, %16, %cst_17 {dimension_numbers = #tpu.dot_dimension_numbers<[1], [0], [0], [1], [0, 0, 1, 1], [], []>} : vector<8x128xf32>, vector<128x512xf32>, vector<8x512xf32> -> vector<8x512xf32>
    %c0_18 = arith.constant 0 : index
    %c0_19 = arith.constant 0 : index
    %c0_20 = arith.constant 0 : index
    %18 = vector.load %arg7[%c0_18, %c0_19, %c0_20] : memref<2x1x512xf32, #tpu.memory_space<vmem>>, vector<1x1x512xf32>
    %19 = vector.shape_cast %18 : vector<1x1x512xf32> to vector<1x512xf32>
    %20 = vector.broadcast %19 : vector<1x512xf32> to vector<8x512xf32>
    %21 = arith.addf %17, %20 : vector<8x512xf32>
    %cst_21 = arith.constant 0.000000e+00 : f32
    %22 = vector.broadcast %cst_21 : f32 to vector<8x512xf32>
    %23 = arith.maximumf %21, %22 : vector<8x512xf32>
    %c0_22 = arith.constant 0 : index
    %c0_23 = arith.constant 0 : index
    %c0_24 = arith.constant 0 : index
    %24 = vector.load %arg8[%c0_22, %c0_23, %c0_24] : memref<2x512x128xf32, #tpu.memory_space<vmem>>, vector<1x512x128xf32>
    %25 = vector.shape_cast %24 : vector<1x512x128xf32> to vector<512x128xf32>
    %cst_25 = arith.constant dense<0.000000e+00> : vector<8x128xf32>
    %26 = tpu.matmul %23, %25, %cst_25 {dimension_numbers = #tpu.dot_dimension_numbers<[1], [0], [0], [1], [0, 0, 1, 1], [], []>} : vector<8x512xf32>, vector<512x128xf32>, vector<8x128xf32> -> vector<8x128xf32>
    %c0_26 = arith.constant 0 : index
    %c0_27 = arith.constant 0 : index
    %c0_28 = arith.constant 0 : index
    %27 = vector.load %arg9[%c0_26, %c0_27, %c0_28] : memref<2x1x128xf32, #tpu.memory_space<vmem>>, vector<1x1x128xf32>
    %28 = vector.shape_cast %27 : vector<1x1x128xf32> to vector<1x128xf32>
    %29 = vector.broadcast %28 : vector<1x128xf32> to vector<8x128xf32>
    %30 = arith.addf %26, %29 : vector<8x128xf32>
    %c0_29 = arith.constant 0 : index
    %c0_30 = arith.constant 0 : index
    %c0_31 = arith.constant 0 : index
    %31 = vector.load %arg10[%c0_29, %c0_30, %c0_31] : memref<2x8x128xf32, #tpu.memory_space<vmem>>, vector<1x8x128xf32>
    %32 = vector.shape_cast %31 : vector<1x8x128xf32> to vector<8x128xf32>
    %33 = vector.shape_cast %30 : vector<8x128xf32> to vector<1x8x128xf32>
    tpu.vector_store %arg10[%c0_29, %c0_30, %c0_31], %33 {strides = array<i32>} : memref<2x8x128xf32, #tpu.memory_space<vmem>>, vector<1x8x128xf32>,
    %c1 = arith.constant 1 : index
    %c0_32 = arith.constant 0 : index
    %c0_33 = arith.constant 0 : index
    %34 = vector.load %arg3[%c1, %c0_32, %c0_33] : memref<2x8x128xf32, #tpu.memory_space<vmem>>, vector<1x8x128xf32>
    %35 = vector.shape_cast %34 : vector<1x8x128xf32> to vector<8x128xf32>
    %cst_34 = arith.constant dense<0.000000e+00> : vector<8x128xf32>
    %36 = tpu.matmul %0, %35, %cst_34 {dimension_numbers = #tpu.dot_dimension_numbers<[1], [0], [0], [1], [0, 0, 1, 1], [], []>} : vector<8x8xf32>, vector<8x128xf32>, vector<8x128xf32> -> vector<8x128xf32>
    %c1_35 = arith.constant 1 : index
    %c0_36 = arith.constant 0 : index
    %c0_37 = arith.constant 0 : index
    %37 = vector.load %arg4[%c1_35, %c0_36, %c0_37] : memref<2x4x128xf32, #tpu.memory_space<vmem>>, vector<1x4x128xf32>
    %38 = vector.shape_cast %37 : vector<1x4x128xf32> to vector<4x128xf32>
    %cst_38 = arith.constant dense<0.000000e+00> : vector<8x128xf32>
    %39 = tpu.matmul %1, %38, %cst_38 {dimension_numbers = #tpu.dot_dimension_numbers<[1], [0], [0], [1], [0, 0, 1, 1], [], []>} : vector<8x4xf32>, vector<4x128xf32>, vector<8x128xf32> -> vector<8x128xf32>
    %40 = arith.addf %36, %39 : vector<8x128xf32>
    %c1_39 = arith.constant 1 : index
    %c0_40 = arith.constant 0 : index
    %c0_41 = arith.constant 0 : index
    %41 = vector.load %arg5[%c1_39, %c0_40, %c0_41] : memref<2x1x128xf32, #tpu.memory_space<vmem>>, vector<1x1x128xf32>
    %42 = vector.shape_cast %41 : vector<1x1x128xf32> to vector<1x128xf32>
    %43 = vector.broadcast %42 : vector<1x128xf32> to vector<8x128xf32>
    %44 = arith.addf %40, %43 : vector<8x128xf32>
    %cst_42 = arith.constant 0.000000e+00 : f32
    %45 = vector.broadcast %cst_42 : f32 to vector<8x128xf32>
    %46 = arith.maximumf %44, %45 : vector<8x128xf32>
    %c1_43 = arith.constant 1 : index
    %c0_44 = arith.constant 0 : index
    %c0_45 = arith.constant 0 : index
    %47 = vector.load %arg6[%c1_43, %c0_44, %c0_45] : memref<2x128x512xf32, #tpu.memory_space<vmem>>, vector<1x128x512xf32>
    %48 = vector.shape_cast %47 : vector<1x128x512xf32> to vector<128x512xf32>
    %cst_46 = arith.constant dense<0.000000e+00> : vector<8x512xf32>
    %49 = tpu.matmul %46, %48, %cst_46 {dimension_numbers = #tpu.dot_dimension_numbers<[1], [0], [0], [1], [0, 0, 1, 1], [], []>} : vector<8x128xf32>, vector<128x512xf32>, vector<8x512xf32> -> vector<8x512xf32>
    %c1_47 = arith.constant 1 : index
    %c0_48 = arith.constant 0 : index
    %c0_49 = arith.constant 0 : index
    %50 = vector.load %arg7[%c1_47, %c0_48, %c0_49] : memref<2x1x512xf32, #tpu.memory_space<vmem>>, vector<1x1x512xf32>
    %51 = vector.shape_cast %50 : vector<1x1x512xf32> to vector<1x512xf32>
    %52 = vector.broadcast %51 : vector<1x512xf32> to vector<8x512xf32>
    %53 = arith.addf %49, %52 : vector<8x512xf32>
    %cst_50 = arith.constant 0.000000e+00 : f32
    %54 = vector.broadcast %cst_50 : f32 to vector<8x512xf32>
    %55 = arith.maximumf %53, %54 : vector<8x512xf32>
    %c1_51 = arith.constant 1 : index
    %c0_52 = arith.constant 0 : index
    %c0_53 = arith.constant 0 : index
    %56 = vector.load %arg8[%c1_51, %c0_52, %c0_53] : memref<2x512x128xf32, #tpu.memory_space<vmem>>, vector<1x512x128xf32>
    %57 = vector.shape_cast %56 : vector<1x512x128xf32> to vector<512x128xf32>
    %cst_54 = arith.constant dense<0.000000e+00> : vector<8x128xf32>
    %58 = tpu.matmul %55, %57, %cst_54 {dimension_numbers = #tpu.dot_dimension_numbers<[1], [0], [0], [1], [0, 0, 1, 1], [], []>} : vector<8x512xf32>, vector<512x128xf32>, vector<8x128xf32> -> vector<8x128xf32>
    %c1_55 = arith.constant 1 : index
    %c0_56 = arith.constant 0 : index
    %c0_57 = arith.constant 0 : index
    %59 = vector.load %arg9[%c1_55, %c0_56, %c0_57] : memref<2x1x128xf32, #tpu.memory_space<vmem>>, vector<1x1x128xf32>
    %60 = vector.shape_cast %59 : vector<1x1x128xf32> to vector<1x128xf32>
    %61 = vector.broadcast %60 : vector<1x128xf32> to vector<8x128xf32>
    %62 = arith.addf %58, %61 : vector<8x128xf32>
    %c1_58 = arith.constant 1 : index
    %c0_59 = arith.constant 0 : index
    %c0_60 = arith.constant 0 : index
    %63 = vector.load %arg10[%c1_58, %c0_59, %c0_60] : memref<2x8x128xf32, #tpu.memory_space<vmem>>, vector<1x8x128xf32>
    %64 = vector.shape_cast %63 : vector<1x8x128xf32> to vector<8x128xf32>
    %65 = vector.shape_cast %62 : vector<8x128xf32> to vector<1x8x128xf32>
    tpu.vector_store %arg10[%c1_58, %c0_59, %c0_60], %65 {strides = array<i32>} : memref<2x8x128xf32, #tpu.memory_space<vmem>>, vector<1x8x128xf32>,
    return
  }
  func.func @transform_0(%arg0: i32) -> (i32, i32) {
    %c0_i32 = arith.constant 0 : i32
    %c0_i32_0 = arith.constant 0 : i32
    return %arg0, %c0_i32 : i32, i32
  }
  func.func @transform_1(%arg0: i32) -> (i32, i32) {
    %c0_i32 = arith.constant 0 : i32
    %c0_i32_0 = arith.constant 0 : i32
    return %arg0, %c0_i32 : i32, i32
  }
  func.func @transform_2(%arg0: i32) -> (i32, i32, i32) {
    %c0_i32 = arith.constant 0 : i32
    %c0_i32_0 = arith.constant 0 : i32
    %c0_i32_1 = arith.constant 0 : i32
    %c0_i32_2 = arith.constant 0 : i32
    return %c0_i32, %c0_i32_0, %c0_i32_1 : i32, i32, i32
  }
  func.func @transform_3(%arg0: i32) -> (i32, i32, i32) {
    %c0_i32 = arith.constant 0 : i32
    %c0_i32_0 = arith.constant 0 : i32
    %c0_i32_1 = arith.constant 0 : i32
    %c0_i32_2 = arith.constant 0 : i32
    return %c0_i32, %c0_i32_0, %c0_i32_1 : i32, i32, i32
  }
  func.func @transform_4(%arg0: i32) -> (i32, i32, i32) {
    %c0_i32 = arith.constant 0 : i32
    %c0_i32_0 = arith.constant 0 : i32
    %c0_i32_1 = arith.constant 0 : i32
    %c0_i32_2 = arith.constant 0 : i32
    return %c0_i32, %c0_i32_0, %c0_i32_1 : i32, i32, i32
  }
  func.func @transform_5(%arg0: i32) -> (i32, i32, i32) {
    %c0_i32 = arith.constant 0 : i32
    %c0_i32_0 = arith.constant 0 : i32
    %c0_i32_1 = arith.constant 0 : i32
    %c0_i32_2 = arith.constant 0 : i32
    return %c0_i32, %c0_i32_0, %c0_i32_1 : i32, i32, i32
  }
  func.func @transform_6(%arg0: i32) -> (i32, i32, i32) {
    %c0_i32 = arith.constant 0 : i32
    %c0_i32_0 = arith.constant 0 : i32
    %c0_i32_1 = arith.constant 0 : i32
    %c0_i32_2 = arith.constant 0 : i32
    return %c0_i32, %c0_i32_0, %c0_i32_1 : i32, i32, i32
  }
  func.func @transform_7(%arg0: i32) -> (i32, i32, i32) {
    %c0_i32 = arith.constant 0 : i32
    %c0_i32_0 = arith.constant 0 : i32
    %c0_i32_1 = arith.constant 0 : i32
    %c0_i32_2 = arith.constant 0 : i32
    return %c0_i32, %c0_i32_0, %c0_i32_1 : i32, i32, i32
  }
  func.func @transform_8(%arg0: i32) -> (i32, i32, i32) {
    %c0_i32 = arith.constant 0 : i32
    %c0_i32_0 = arith.constant 0 : i32
    %c0_i32_1 = arith.constant 0 : i32
    %c0_i32_2 = arith.constant 0 : i32
    return %c0_i32, %c0_i32_0, %c0_i32_1 : i32, i32, i32
  }
  func.func @transform_9(%arg0: i32) -> (i32, i32, i32) {
    %c0_i32 = arith.constant 0 : i32
    %c0_i32_0 = arith.constant 0 : i32
    %c0_i32_1 = arith.constant 0 : i32
    return %c0_i32, %arg0, %c0_i32_0 : i32, i32, i32
  }
}

</mosaic_0001>

<bundles_post_ra>
// kernel: tpu_custom_call.1
= control target key start
LH: loop header
LB: loop body
LE: loop exit
PB: predicated region body
PF: predicated region fallthrough
CT: control target
= control target key end

     0   :  { %14 = vsyncpa [#allocation3], 0  ;;  %s2097_s0 = inlined_call_operand.hbm [shape: f32[8,8], index: 0, kind: input, shape index: {}]   ;;  %s2098_s1 = inlined_call_operand.vmem [shape: f32[8,4], index: 1, kind: input, shape index: {}]   ;;  %s2099_s2 = inlined_call_operand.vmem [shape: f32[2,8,128], index: 2, kind: input, shape index: {}]   ;;  %s2100_s3 = inlined_call_operand.hbm [shape: f32[2,4,128], index: 3, kind: input, shape index: {}]   ;;  %s2101_s4 = inlined_call_operand.vmem [shape: f32[2,1,128], index: 4, kind: input, shape index: {}]   ;;  %s2102_s5 = inlined_call_operand.hbm [shape: f32[2,128,512], index: 5, kind: input, shape index: {}]   ;;  %s2103_s6 = inlined_call_operand.vmem [shape: f32[2,1,512], index: 6, kind: input, shape index: {}]   ;;  %s2104_s7 = inlined_call_operand.hbm [shape: f32[2,512,128], index: 7, kind: input, shape index: {}]   ;;  %s2105_s8 = inlined_call_operand.vmem [shape: f32[2,1,128], index: 8, kind: input, shape index: {}]   ;;  %s2106_s9 = inlined_call_operand.hbm [shape: f32[2,8,128], index: 9, kind: output, shape index: {}]  }
   0x1   :  { %15 = vsyncpa [#allocation6], 0 }
   0x2   :  { %16 = vsyncpa [#allocation9], 0 }
   0x3   :  { %17 = vsyncpa [#allocation4], 0  ;;  %s1889_s30 = smov [#allocation5]   ;;  %s1771_s13 = scalar_lea.hbm %s2100_s3, 128 }
   0x4   :  { %s37_s10 = sshll.u32 %s1889_s30, 4  ;;  %p1772_p0 = scmp.ne.s32.totalorder %s2100_s3, %s1771_s13  ;;  %s38_s10 = int_to_ptr.vmem [resolvable:$true] %s37_s10 }
   0x5   :  { %p1775_p1 = scmp.lt.u32.totalorder %s1771_s13, %s2100_s3 }
   0x7   :  { %p1777_p2 = pnand %p1775_p1, %p1772_p0 }
   0x9   :  { %1780 = shalt.err (!%p1777_p2)
}
   0xa   :  { %s1781_s18 = scalar_lea.vmem %s38_s10, 128  ;;  %p1786_p4 = scmp.lt.s32.totalorder %s38_s10, %s38_s10 }
   0xb   :  { %p1782_p3 = scmp.ne.s32.totalorder %s38_s10, %s1781_s18  ;;  %p1787_p5 = scmp.lt.s32.totalorder %s1781_s18, %s1781_s18 }
   0xd   :  { %p1788_p6 = por %p1787_p5, %p1786_p4 }
   0xf   :  { %p1789_p7 = pnand %p1788_p6, %p1782_p3 }
  0x11   :  { %1792 = shalt.err (!%p1789_p7)
}
  0x12   :  { %s1890_s19 = smov 64   ;;  %s1891_s20 = smov 4  }
  0x13   :  { %43 = dma.hbm_to_vmem [thread:$0]  %s2100_s3, 128, %s38_s10, [#allocation6], %s1890_s19, %s1890_s19, %s1891_s20  }
  0x14   :  { %s1892_s23 = smov [#allocation2]   ;;  %s1893_s25 = smov [#allocation7]  }
  0x15   :  { %s24_s24 = sshll.u32 %s1892_s23, 4  ;;  %s51_s26 = sshll.u32 %s1893_s25, 4  ;;  %s25_s24 = int_to_ptr.vmem [resolvable:$true] %s24_s24  ;;  %s52_s26 = int_to_ptr.vmem [resolvable:$true] %s51_s26 }
  0x16   :  { %s1793_s29 = scalar_lea.hbm %s2097_s0, 128 }
  0x17   :  { %p1794_p8 = scmp.ne.s32.totalorder %s2097_s0, %s1793_s29  ;;  %p1797_p9 = scmp.lt.u32.totalorder %s1793_s29, %s2097_s0 }
  0x19   :  { %p1799_p10 = pnand %p1797_p9, %p1794_p8 }
  0x1b   :  { %1802 = shalt.err (!%p1799_p10)
}
  0x1c   :  { %s1803_s3 = scalar_lea.vmem %s25_s24, 128  ;;  %p1808_p12 = scmp.lt.s32.totalorder %s25_s24, %s25_s24 }
  0x1d   :  { %p1804_p11 = scmp.ne.s32.totalorder %s25_s24, %s1803_s3  ;;  %p1809_p13 = scmp.lt.s32.totalorder %s1803_s3, %s1803_s3 }
  0x1f   :  { %p1810_p0 = por %p1809_p13, %p1808_p12 }
  0x21   :  { %p1811_p1 = pnand %p1810_p0, %p1804_p11 }
  0x23   :  { %1814 = shalt.err (!%p1811_p1)
}
  0x24   :  { %27 = dma.hbm_to_vmem [thread:$0]  %s2097_s0, 128, %s25_s24, [#allocation3]  }
  0x25   :  { %s1815_s17 = scalar_lea.hbm %s2102_s5, 16384 }
  0x26   :  { %p1816_p2 = scmp.ne.s32.totalorder %s2102_s5, %s1815_s17  ;;  %p1819_p3 = scmp.lt.u32.totalorder %s1815_s17, %s2102_s5 }
  0x28   :  { %p1821_p4 = pnand %p1819_p3, %p1816_p2 }
  0x2a   :  { %1824 = shalt.err (!%p1821_p4)
}
  0x2b   :  { %s1825_s22 = scalar_lea.vmem %s52_s26, 16384  ;;  %p1830_p6 = scmp.lt.s32.totalorder %s52_s26, %s52_s26 }
  0x2c   :  { %p1826_p5 = scmp.ne.s32.totalorder %s52_s26, %s1825_s22  ;;  %p1831_p7 = scmp.lt.s32.totalorder %s1825_s22, %s1825_s22 }
  0x2e   :  { %p1832_p8 = por %p1831_p7, %p1830_p6 }
  0x30   :  { %p1833_p9 = pnand %p1832_p8, %p1826_p5 }
  0x32   :  { %1836 = shalt.err (!%p1833_p9)
}
  0x33   :  { %s1894_s0 = smov 512   ;;  %s1895_s23 = smov 32  }
  0x34   :  { %57 = dma.hbm_to_vmem [thread:$0]  %s2102_s5, 16384, %s52_s26, [#allocation6], %s1894_s0, %s1894_s0, %s1895_s23  }
  0x35   :  { %s1896_s27 = smov [#allocation8]   ;;  %s1837_s11 = scalar_lea.hbm %s2104_s7, 16384 }
  0x36   :  { %s65_s28 = sshll.u32 %s1896_s27, 4  ;;  %p1838_p10 = scmp.ne.s32.totalorder %s2104_s7, %s1837_s11  ;;  %s66_s28 = int_to_ptr.vmem [resolvable:$true] %s65_s28 }
  0x37   :  { %p1841_p11 = scmp.lt.u32.totalorder %s1837_s11, %s2104_s7 }
  0x39   :  { %p1843_p12 = pnand %p1841_p11, %p1838_p10 }
  0x3b   :  { %1846 = shalt.err (!%p1843_p12)
}
  0x3c   :  { %s1847_s14 = scalar_lea.vmem %s66_s28, 16384  ;;  %p1852_p0 = scmp.lt.s32.totalorder %s66_s28, %s66_s28 }
  0x3d   :  { %p1848_p13 = scmp.ne.s32.totalorder %s66_s28, %s1847_s14  ;;  %p1853_p1 = scmp.lt.s32.totalorder %s1847_s14, %s1847_s14 }
  0x3f   :  { %p1854_p2 = por %p1853_p1, %p1852_p0 }
  0x41   :  { %p1855_p3 = pnand %p1854_p2, %p1848_p13 }
  0x43   :  { %1858 = shalt.err (!%p1855_p3)
}
  0x44   :  { %s1897_s5 = smov 128   ;;  %s1898_s26 = smov 8  }
  0x45   :  { %71 = dma.hbm_to_vmem [thread:$0]  %s2104_s7, 16384, %s66_s28, [#allocation9], %s1897_s5, %s1897_s5, %s1898_s26  }
  0x46   :  { %1881 = dma.done.wait [#allocation3], 128  }
  0x47   :  { %1882 = vsyncadd [#allocation3], 4294967168 }
  0x48   :  { %1883 = dma.done.wait [#allocation6], 16512  }
  0x49   :  { %1884 = vsyncadd [#allocation6], 4294950784 }
  0x4a   :  { %1885 = dma.done.wait [#allocation9], 16384  }
  0x4b   :  { %1886 = vsyncadd [#allocation9], 4294950912  ;;  %v1899_v0 = vmov 0.0   ;;  %vm1900_vm0 = vmmov 0   ;;  %vm94_vm1 = vcmask 1043456   ;;  %vm90_vm2 = vcmask 31744  }
  0x4c   :  { %1482 = vmatprep.subr.mxu0 %v1899_v0  ;;  %1487 = vmatprep.subr.mxu1 %v1899_v0  ;;  %vm168_vm3 = vcmask 64512   ;;  %v89_v1 = vld [vmem:[#allocation5] sm:$0xf]  ;;  %v88_v2 = vld [vmem:[%s2099_s2] sm:$0xff]  ;;  %v252_v5 = vld [vmem:[#allocation7 + $0x8] sm:$0xff]  ;;  %s1901_s30 = smov [#allocation10]  }
  0x4d   :  { %1484 = vmatprep.mubr.msk.f32.mxu0 %vm1900_vm0, %v1899_v0  ;;  %1489 = vmatprep.mubr.msk.f32.mxu1 %vm1900_vm0, %v1899_v0  ;;  %v2015_v3 = vld [vmem:[%s2098_s1] sm:$0xff]  ;;  %v256_v6 = vld [vmem:[#allocation7 + $0x28] sm:$0xff]  ;;  %v254_v8 = vld [vmem:[#allocation7 + $0x18] sm:$0xff]  ;;  %s1306_s11 = sshll.u32 %s1901_s30, 4  ;;  %s1307_s11 = int_to_ptr.vmem [resolvable:$true] %s1306_s11 }
  0x4e   :  { %1483 = vmatpush3.msk.msra.mxu0 %vm94_vm1, %v89_v1  ;;  %1488 = vmatpush3.msra.mxu1 %v88_v2  ;;  %v2018_v4 = vld [vmem:[#allocation2] sm:$0xff]  ;;  %v1502_v7 = vpack.c.bf16 %v256_v6, %v252_v5  ;;  %v258_v9 = vld [vmem:[#allocation7 + $0x38] sm:$0xff]  ;;  %v251_v10 = vld [vmem:[#allocation7] sm:$0xff]  ;;  %s1859_s12 = scalar_lea.vmem %s1307_s11, 256  ;;  %p1864_p5 = scmp.lt.s32.totalorder %s1307_s11, %s1307_s11 }
  0x4f   :  { %1485 = vmatmul.mubr.msk.f32.vlgmr.msra.gmra.mrb[0].mxu0 %vm90_vm2, %v2015_v3  ;;  %1490 = vmatmul.mubr.msk.f32.vlgmr.msra.gmra.mrb[0].mxu1 %vm168_vm3, %v2018_v4  ;;  %v1534_v11 = vpack.c.bf16 %v258_v9, %v254_v8  ;;  %v255_v12 = vld [vmem:[#allocation7 + $0x20] sm:$0xff]  ;;  %v253_v13 = vld [vmem:[#allocation7 + $0x10] sm:$0xff]  ;;  %v260_v17 = vld [vmem:[#allocation7 + $0x48] sm:$0xff]  ;;  %p1860_p4 = scmp.ne.s32.totalorder %s1307_s11, %s1859_s12  ;;  %p1865_p6 = scmp.lt.s32.totalorder %s1859_s12, %s1859_s12 }
  0x50   :  { %v257_v14 = vld [vmem:[#allocation7 + $0x30] sm:$0xff]  ;;  %401 = vmatprep.mubr.f32.mxu0 %v1899_v0  ;;  %472 = vmatprep.mubr.f32.mxu1 %v1899_v0  ;;  %v1504_v15 = vpack.c.bf16 %v255_v12, %v251_v10  ;;  %v264_v18 = vld [vmem:[#allocation7 + $0x68] sm:$0xff]  ;;  %v262_v19 = vld [vmem:[#allocation7 + $0x58] sm:$0xff] }
  0x51   :  { %1503 = vmatprep.subr.bf16.mxu0 %v1502_v7  ;;  %v1536_v16 = vpack.c.bf16 %v257_v14, %v253_v13  ;;  %1535 = vmatprep.subr.bf16.mxu1 %v1534_v11  ;;  %v1506_v20 = vpack.c.bf16 %v264_v18, %v260_v17  ;;  %v266_v21 = vld [vmem:[#allocation7 + $0x78] sm:$0xff]  ;;  %v259_v22 = vld [vmem:[#allocation7 + $0x40] sm:$0xff]  ;;  %v261_v26 = vld [vmem:[#allocation7 + $0x50] sm:$0xff]  ;;  %p1866_p7 = por %p1865_p6, %p1864_p5 }
  0x52   :  { %v263_v23 = vld [vmem:[#allocation7 + $0x60] sm:$0xff]  ;;  %1505 = vmatpush1.bf16.msra.mxu0 %v1504_v15  ;;  %v1538_v24 = vpack.c.bf16 %v266_v21, %v262_v19  ;;  %v265_v27 = vld [vmem:[#allocation7 + $0x70] sm:$0xff]  ;;  %v268_v28 = vld [vmem:[#allocation7 + $0x88] sm:$0xff] }
  0x53   :  { %1537 = vmatpush1.bf16.msra.mxu1 %v1536_v16  ;;  %v1508_v25 = vpack.c.bf16 %v263_v23, %v259_v22  ;;  %1507 = vmatprep.subr.bf16.mxu0 %v1506_v20  ;;  %v1540_v29 = vpack.c.bf16 %v265_v27, %v261_v26  ;;  %v272_v30 = vld [vmem:[#allocation7 + $0xa8] sm:$0xff]  ;;  %v270_v31 = vld [vmem:[#allocation7 + $0x98] sm:$0xff]  ;;  %v267_v35 = vld [vmem:[#allocation7 + $0x80] sm:$0xff]  ;;  %p1867_p8 = pnand %p1866_p7, %p1860_p4 }
  0x54   :  { %v274_v32 = vld [vmem:[#allocation7 + $0xb8] sm:$0xff]  ;;  %1539 = vmatprep.subr.bf16.mxu1 %v1538_v24  ;;  %v1510_v33 = vpack.c.bf16 %v272_v30, %v268_v28  ;;  %v271_v36 = vld [vmem:[#allocation7 + $0xa0] sm:$0xff]  ;;  %v269_v37 = vld [vmem:[#allocation7 + $0x90] sm:$0xff] }
  0x55   :  { %v1542_v34 = vpack.c.bf16 %v274_v32, %v270_v31  ;;  %v273_v38 = vld [vmem:[#allocation7 + $0xb0] sm:$0xff]  ;;  %v276_v39 = vld [vmem:[#allocation7 + $0xc8] sm:$0xff]  ;;  %v1512_v41 = vpack.c.bf16 %v271_v36, %v267_v35  ;;  %v278_v43 = vld [vmem:[#allocation7 + $0xd8] sm:$0xff] }
  0x56   :  { %v280_v40 = vld [vmem:[#allocation7 + $0xe8] sm:$0xff]  ;;  %1509 = vmatpush1.bf16.msra.mxu0 %v1508_v25  ;;  %v1544_v42 = vpack.c.bf16 %v273_v38, %v269_v37  ;;  %v282_v44 = vld [vmem:[#allocation7 + $0xf8] sm:$0xff]  ;;  %v275_v45 = vld [vmem:[#allocation7 + $0xc0] sm:$0xff] }
  0x57   :  { %1541 = vmatpush1.bf16.msra.mxu1 %v1540_v29  ;;  %1511 = vmatprep.subr.bf16.mxu0 %v1510_v33  ;;  %v1514_v46 = vpack.c.bf16 %v280_v40, %v276_v39  ;;  %v1546_v47 = vpack.c.bf16 %v282_v44, %v278_v43  ;;  %v279_v48 = vld [vmem:[#allocation7 + $0xe0] sm:$0xff]  ;;  %v277_v49 = vld [vmem:[#allocation7 + $0xd0] sm:$0xff]  ;;  %v284_v51 = vld [vmem:[#allocation7 + $0x108] sm:$0xff] }
  0x58   :  { %1543 = vmatprep.subr.bf16.mxu1 %v1542_v34  ;;  %v281_v50 = vld [vmem:[#allocation7 + $0xf0] sm:$0xff]  ;;  %v288_v52 = vld [vmem:[#allocation7 + $0x128] sm:$0xff]  ;;  %v286_v53 = vld [vmem:[#allocation7 + $0x118] sm:$0xff]  ;;  %v1516_v55 = vpack.c.bf16 %v279_v48, %v275_v45 }
  0x59   :  { %v290_v54 = vld [vmem:[#allocation7 + $0x138] sm:$0xff]  ;;  %v1548_v56 = vpack.c.bf16 %v281_v50, %v277_v49  ;;  %v283_v57 = vld [vmem:[#allocation7 + $0x100] sm:$0xff]  ;;  %v1518_v59 = vpack.c.bf16 %v288_v52, %v284_v51  ;;  %v285_v61 = vld [vmem:[#allocation7 + $0x110] sm:$0xff] }
  0x5a   :  { %1513 = vmatpush1.bf16.msra.mxu0 %v1512_v41  ;;  %v287_v58 = vld [vmem:[#allocation7 + $0x120] sm:$0xff]  ;;  %v1550_v60 = vpack.c.bf16 %v290_v54, %v286_v53  ;;  %v289_v62 = vld [vmem:[#allocation7 + $0x130] sm:$0xff]  ;;  %v292_v63 = vld [vmem:[#allocation7 + $0x148] sm:$0xff] }
  0x5b   :  { %1545 = vmatpush1.bf16.msra.mxu1 %v1544_v42  ;;  %1515 = vmatprep.subr.bf16.mxu0 %v1514_v46  ;;  %v296_v1 = vld [vmem:[#allocation7 + $0x168] sm:$0xff]  ;;  %v294_v2 = vld [vmem:[#allocation7 + $0x158] sm:$0xff]  ;;  %v1520_v6 = vpack.c.bf16 %v287_v58, %v283_v57  ;;  %v1552_v7 = vpack.c.bf16 %v289_v62, %v285_v61  ;;  %v291_v8 = vld [vmem:[#allocation7 + $0x140] sm:$0xff] }
  0x5c   :  { %1547 = vmatprep.subr.bf16.mxu1 %v1546_v47  ;;  %v298_v5 = vld [vmem:[#allocation7 + $0x178] sm:$0xff]  ;;  %v295_v9 = vld [vmem:[#allocation7 + $0x160] sm:$0xff]  ;;  %v1522_v10 = vpack.c.bf16 %v296_v1, %v292_v63  ;;  %v293_v12 = vld [vmem:[#allocation7 + $0x150] sm:$0xff] }
  0x5d   :  { %v1554_v11 = vpack.c.bf16 %v298_v5, %v294_v2  ;;  %v297_v13 = vld [vmem:[#allocation7 + $0x170] sm:$0xff]  ;;  %v300_v14 = vld [vmem:[#allocation7 + $0x188] sm:$0xff]  ;;  %v302_v16 = vld [vmem:[#allocation7 + $0x198] sm:$0xff]  ;;  %v1524_v18 = vpack.c.bf16 %v295_v9, %v291_v8 }
  0x5e   :  { %1517 = vmatpush1.bf16.msra.mxu0 %v1516_v55  ;;  %v304_v15 = vld [vmem:[#allocation7 + $0x1a8] sm:$0xff]  ;;  %v306_v17 = vld [vmem:[#allocation7 + $0x1b8] sm:$0xff]  ;;  %v1556_v19 = vpack.c.bf16 %v297_v13, %v293_v12  ;;  %v299_v22 = vld [vmem:[#allocation7 + $0x180] sm:$0xff] }
  0x5f   :  { %1549 = vmatpush1.bf16.msra.mxu1 %v1548_v56  ;;  %1519 = vmatprep.subr.bf16.mxu0 %v1518_v59  ;;  %v1526_v20 = vpack.c.bf16 %v304_v15, %v300_v14  ;;  %v1558_v21 = vpack.c.bf16 %v306_v17, %v302_v16  ;;  %v303_v23 = vld [vmem:[#allocation7 + $0x1a0] sm:$0xff]  ;;  %v301_v24 = vld [vmem:[#allocation7 + $0x190] sm:$0xff]  ;;  %v308_v28 = vld [vmem:[#allocation7 + $0x1c8] sm:$0xff] }
  0x60   :  { %1551 = vmatprep.subr.bf16.mxu1 %v1550_v60  ;;  %v1528_v25 = vpack.c.bf16 %v303_v23, %v299_v22  ;;  %v305_v26 = vld [vmem:[#allocation7 + $0x1b0] sm:$0xff]  ;;  %v312_v29 = vld [vmem:[#allocation7 + $0x1e8] sm:$0xff]  ;;  %v310_v30 = vld [vmem:[#allocation7 + $0x1d8] sm:$0xff] }
  0x61   :  { %v1560_v27 = vpack.c.bf16 %v305_v26, %v301_v24  ;;  %v1530_v31 = vpack.c.bf16 %v312_v29, %v308_v28  ;;  %v314_v32 = vld [vmem:[#allocation7 + $0x1f8] sm:$0xff]  ;;  %v307_v33 = vld [vmem:[#allocation7 + $0x1c0] sm:$0xff]  ;;  %v309_v36 = vld [vmem:[#allocation7 + $0x1d0] sm:$0xff] }
  0x62   :  { %1521 = vmatpush1.bf16.msra.mxu0 %v1520_v6  ;;  %v1562_v34 = vpack.c.bf16 %v314_v32, %v310_v30  ;;  %v311_v35 = vld [vmem:[#allocation7 + $0x1e0] sm:$0xff]  ;;  %v313_v37 = vld [vmem:[#allocation7 + $0x1f0] sm:$0xff]  ;;  %v500_v41 = vld [vmem:[#allocation8 + $0x88] sm:$0xff] }
  0x63   :  { %1553 = vmatpush1.bf16.msra.mxu1 %v1552_v7  ;;  %1523 = vmatprep.subr.bf16.mxu0 %v1522_v10  ;;  %v1532_v38 = vpack.c.bf16 %v311_v35, %v307_v33  ;;  %v1564_v39 = vpack.c.bf16 %v313_v37, %v309_v36  ;;  %v499_v40 = vld [vmem:[#allocation8 + $0x80] sm:$0xff]  ;;  %v532_v44 = vld [vmem:[#allocation8 + $0x188] sm:$0xff]  ;;  %v1323_v48 = vld [vmem:[%s2101_s4] ss:$0 sm:$0xff] }
  0x64   :  { %1555 = vmatprep.subr.bf16.mxu1 %v1554_v11  ;;  %v531_v42 = vld [vmem:[#allocation8 + $0x180] sm:$0xff]  ;;  %v1566_v43 = vpack.c.bf16 %v500_v41, %v499_v40  ;;  %v484_v50 = vld [vmem:[#allocation8 + $0x8] sm:$0xff]  ;;  %v501_v56 = vld [vmem:[#allocation8 + $0x90] sm:$0xff] }
  0x65   :  { %v1598_v45 = vpack.c.bf16 %v532_v44, %v531_v42  ;;  %v483_v49 = vld [vmem:[#allocation8] sm:$0xff]  ;;  %v516_v55 = vld [vmem:[#allocation8 + $0x108] sm:$0xff]  ;;  %v502_v57 = vld [vmem:[#allocation8 + $0x98] sm:$0xff] }
  0x66   :  { %1525 = vmatpush1.bf16.msra.mxu0 %v1524_v18  ;;  %v515_v54 = vld [vmem:[#allocation8 + $0x100] sm:$0xff]  ;;  %v533_v58 = vld [vmem:[#allocation8 + $0x190] sm:$0xff]  ;;  %v534_v59 = vld [vmem:[#allocation8 + $0x198] sm:$0xff]  ;;  %v1568_v61 = vpack.c.bf16 %v484_v50, %v483_v49  ;;  %v1570_v5 = vpack.c.bf16 %v502_v57, %v501_v56 }
  0x67   :  { %1557 = vmatpush1.bf16.msra.mxu1 %v1556_v19  ;;  %1527 = vmatprep.subr.bf16.mxu0 %v1526_v20  ;;  %v1600_v62 = vpack.c.bf16 %v516_v55, %v515_v54  ;;  %v485_v63 = vld [vmem:[#allocation8 + $0x10] sm:$0xff]  ;;  %v486_v1 = vld [vmem:[#allocation8 + $0x18] sm:$0xff]  ;;  %v1602_v6 = vpack.c.bf16 %v534_v59, %v533_v58  ;;  %v503_v9 = vld [vmem:[#allocation8 + $0xa0] sm:$0xff] }
  0x68   :  { %1559 = vmatprep.subr.bf16.mxu1 %v1558_v21  ;;  %v517_v7 = vld [vmem:[#allocation8 + $0x110] sm:$0xff]  ;;  %v518_v8 = vld [vmem:[#allocation8 + $0x118] sm:$0xff]  ;;  %v504_v10 = vld [vmem:[#allocation8 + $0xa8] sm:$0xff]  ;;  %v1572_v13 = vpack.c.bf16 %v486_v1, %v485_v63 }
  0x69   :  { %v535_v11 = vld [vmem:[#allocation8 + $0x1a0] sm:$0xff]  ;;  %v536_v12 = vld [vmem:[#allocation8 + $0x1a8] sm:$0xff]  ;;  %v1604_v14 = vpack.c.bf16 %v518_v8, %v517_v7  ;;  %v1574_v17 = vpack.c.bf16 %v504_v10, %v503_v9  ;;  %v505_v21 = vld [vmem:[#allocation8 + $0xb0] sm:$0xff] }
  0x6a   :  { %1529 = vmatpush1.bf16.msra.mxu0 %v1528_v25  ;;  %v487_v15 = vld [vmem:[#allocation8 + $0x20] sm:$0xff]  ;;  %v488_v16 = vld [vmem:[#allocation8 + $0x28] sm:$0xff]  ;;  %v1606_v18 = vpack.c.bf16 %v536_v12, %v535_v11  ;;  %v506_v22 = vld [vmem:[#allocation8 + $0xb8] sm:$0xff] }
  0x6b   :  { %1561 = vmatpush1.bf16.msra.mxu1 %v1560_v27  ;;  %1531 = vmatprep.subr.bf16.mxu0 %v1530_v31  ;;  %v519_v19 = vld [vmem:[#allocation8 + $0x120] sm:$0xff]  ;;  %v520_v20 = vld [vmem:[#allocation8 + $0x128] sm:$0xff]  ;;  %v537_v23 = vld [vmem:[#allocation8 + $0x1b0] sm:$0xff]  ;;  %v1576_v25 = vpack.c.bf16 %v488_v16, %v487_v15  ;;  %v1578_v29 = vpack.c.bf16 %v506_v22, %v505_v21  ;;  %v317_v22 = vlaneseq }
  0x6c   :  { %1563 = vmatprep.subr.bf16.mxu1 %v1562_v34  ;;  %v538_v24 = vld [vmem:[#allocation8 + $0x1b8] sm:$0xff]  ;;  %v1608_v26 = vpack.c.bf16 %v520_v20, %v519_v19  ;;  %v489_v27 = vld [vmem:[#allocation8 + $0x30] sm:$0xff]  ;;  %v507_v33 = vld [vmem:[#allocation8 + $0xc0] sm:$0xff] }
  0x6d   :  { %v490_v28 = vld [vmem:[#allocation8 + $0x38] sm:$0xff]  ;;  %v1610_v30 = vpack.c.bf16 %v538_v24, %v537_v23  ;;  %v521_v31 = vld [vmem:[#allocation8 + $0x130] sm:$0xff]  ;;  %v508_v34 = vld [vmem:[#allocation8 + $0xc8] sm:$0xff]  ;;  %v2031_v23 = vshrl.u32 %v317_v22, 7 }
  0x6e   :  { %1533 = vmatpush1.bf16.msra.mxu0 %v1532_v38  ;;  %v522_v32 = vld [vmem:[#allocation8 + $0x138] sm:$0xff]  ;;  %v539_v35 = vld [vmem:[#allocation8 + $0x1c0] sm:$0xff]  ;;  %v540_v36 = vld [vmem:[#allocation8 + $0x1c8] sm:$0xff]  ;;  %v1580_v37 = vpack.c.bf16 %v490_v28, %v489_v27  ;;  %v1582_v41 = vpack.c.bf16 %v508_v34, %v507_v33 }
  0x6f   :  { %1565 = vmatpush1.bf16.msra.mxu1 %v1564_v39  ;;  %1567 = vmatprep.subr.bf16.mxu0 %v1566_v43  ;;  %v1612_v38 = vpack.c.bf16 %v522_v32, %v521_v31  ;;  %v491_v39 = vld [vmem:[#allocation8 + $0x40] sm:$0xff]  ;;  %v492_v40 = vld [vmem:[#allocation8 + $0x48] sm:$0xff]  ;;  %v1614_v42 = vpack.c.bf16 %v540_v36, %v539_v35  ;;  %v525_v55 = vld [vmem:[#allocation8 + $0x150] sm:$0xff]  ;;  %v319_v24 = vsub.s32 0, %v2031_v23  ;;  %v323_v27 = vsub.s32 1, %v2031_v23 }
  0x70   :  { %1599 = vmatprep.subr.bf16.mxu1 %v1598_v45  ;;  %v523_v43 = vld [vmem:[#allocation8 + $0x140] sm:$0xff]  ;;  %v524_v44 = vld [vmem:[#allocation8 + $0x148] sm:$0xff]  ;;  %v509_v45 = vld [vmem:[#allocation8 + $0xd0] sm:$0xff]  ;;  %v1584_v49 = vpack.c.bf16 %v492_v40, %v491_v39  ;;  %v331_v28 = vsub.s32 3, %v2031_v23 }
  0x71   :  { %v1616_v50 = vpack.c.bf16 %v524_v44, %v523_v43  ;;  %v526_v56 = vld [vmem:[#allocation8 + $0x158] sm:$0xff]  ;;  %v511_v57 = vld [vmem:[#allocation8 + $0xe0] sm:$0xff]  ;;  %v512_v58 = vld [vmem:[#allocation8 + $0xe8] sm:$0xff] }
  0x72   :  { %v543_v59 = vld [vmem:[#allocation8 + $0x1e0] sm:$0xff]  ;;  %v1590_v1 = vpack.c.bf16 %v512_v58, %v511_v57  ;;  %v528_v7 = vld [vmem:[#allocation8 + $0x168] sm:$0xff]  ;;  %v513_v10 = vld [vmem:[#allocation8 + $0xf0] sm:$0xff] }
  0x73   :  { %v495_v63 = vld [vmem:[#allocation8 + $0x60] sm:$0xff]  ;;  %v514_v11 = vld [vmem:[#allocation8 + $0xf8] sm:$0xff]  ;;  %v545_v12 = vld [vmem:[#allocation8 + $0x1f0] sm:$0xff] }
  0x74   :  { %v497_v15 = vld [vmem:[#allocation8 + $0x70] sm:$0xff]  ;;  %v498_v16 = vld [vmem:[#allocation8 + $0x78] sm:$0xff]  ;;  %v858_v43 = vld [vmem:[#allocation7 + $0x228] sm:$0xff] }
  0x75   :  { %v529_v19 = vld [vmem:[#allocation8 + $0x170] sm:$0xff]  ;;  %v530_v20 = vld [vmem:[#allocation8 + $0x178] sm:$0xff]  ;;  %v866_v58 = vld [vmem:[#allocation7 + $0x268] sm:$0xff] }
  0x76   :  { %v1628_v21 = vpack.c.bf16 %v530_v20, %v529_v19  ;;  %v856_v44 = vld [vmem:[#allocation7 + $0x218] sm:$0xff]  ;;  %v875_v19 = vld [vmem:[#allocation7 + $0x2b0] sm:$0xff]  ;;  %v878_v20 = vld [vmem:[#allocation7 + $0x2c8] sm:$0xff] }
  0x77   :  { %v880_v22 = vld [vmem:[#allocation7 + $0x2d8] sm:$0xff] }
 0x122   :  { %v164_v46 = vpop.f32.mrb[0].mxu0  ;;  %v238_v47 = vpop.f32.mrb[0].mxu1 }
 0x123   :  { %v239_v51 = vadd.f32 %v238_v47, %v164_v46  ;;  %v1486_v52 = vpop.f32.mrb[1].mxu0  ;;  %v1491_v53 = vpop.f32.mrb[1].mxu1  ;;  %v510_v46 = vld [vmem:[#allocation8 + $0xd8] sm:$0xff]  ;;  %v541_v47 = vld [vmem:[#allocation8 + $0x1d0] sm:$0xff] }
 0x124   :  { %v494_v52 = vld [vmem:[#allocation8 + $0x58] sm:$0xff]  ;;  %v1586_v53 = vpack.c.bf16 %v510_v46, %v509_v45 }
 0x125   :  { %v249_v60 = vadd.f32 %v1323_v48, %v239_v51  ;;  %v542_v48 = vld [vmem:[#allocation8 + $0x1d8] sm:$0xff]  ;;  %v493_v51 = vld [vmem:[#allocation8 + $0x50] sm:$0xff] }
 0x126   :  { %v1618_v54 = vpack.c.bf16 %v542_v48, %v541_v47  ;;  %v860_v45 = vld [vmem:[#allocation7 + $0x238] sm:$0xff] }
 0x127   :  { %v250_v2 = vmax.f32 %v249_v60, 0.0  ;;  %v544_v60 = vld [vmem:[#allocation8 + $0x1e8] sm:$0xff]  ;;  %v1325_v48 = vld [vmem:[%s2099_s2 + $0x8] sm:$0xff]  ;;  %v1662_v57 = vpack.c.bf16 %v860_v45, %v856_v44  ;;  %v887_v44 = vld [vmem:[#allocation7 + $0x310] sm:$0xff] }
 0x128   :  { %v891_v45 = vld [vmem:[#allocation7 + $0x330] sm:$0xff] }
 0x129   :  { %402 = vmatmul.mubr.f32.vlgmr.msra.gmra.mrb[2].mxu0 %v250_v2  ;;  %473 = vmatmul.mubr.f32.vlgmr.msra.gmra.mrb[2].mxu1 %v250_v2  ;;  %v1622_v2 = vpack.c.bf16 %v544_v60, %v543_v59  ;;  %v864_v59 = vld [vmem:[#allocation7 + $0x258] sm:$0xff] }
 0x12a   :  { %1569 = vmatpush3.bf16.msra.mxu0 %v1568_v61  ;;  %1601 = vmatpush3.bf16.msra.mxu1 %v1600_v62  ;;  %v1588_v61 = vpack.c.bf16 %v494_v52, %v493_v51  ;;  %v1620_v62 = vpack.c.bf16 %v526_v56, %v525_v55  ;;  %v862_v55 = vld [vmem:[#allocation7 + $0x248] sm:$0xff]  ;;  %v868_v60 = vld [vmem:[#allocation7 + $0x278] sm:$0xff] }
 0x12b   :  { %1571 = vmatprep.subr.bf16.mxu0 %v1570_v5  ;;  %1603 = vmatprep.subr.bf16.mxu1 %v1602_v6  ;;  %v496_v5 = vld [vmem:[#allocation8 + $0x68] sm:$0xff]  ;;  %v527_v6 = vld [vmem:[#allocation8 + $0x160] sm:$0xff] }
 0x12c   :  { %v1592_v8 = vpack.c.bf16 %v496_v5, %v495_v63  ;;  %v1624_v9 = vpack.c.bf16 %v528_v7, %v527_v6  ;;  %v861_v63 = vld [vmem:[#allocation7 + $0x240] sm:$0xff]  ;;  %v1666_v5 = vpack.c.bf16 %v868_v60, %v864_v59  ;;  %v863_v6 = vld [vmem:[#allocation7 + $0x250] sm:$0xff]  ;;  %v902_v60 = vld [vmem:[#allocation7 + $0x388] sm:$0xff] }
 0x12d   :  { %v867_v7 = vld [vmem:[#allocation7 + $0x270] sm:$0xff] }
 0x12e   :  { %1573 = vmatpush3.bf16.msra.mxu0 %v1572_v13  ;;  %1605 = vmatpush3.bf16.msra.mxu1 %v1604_v14  ;;  %v1594_v13 = vpack.c.bf16 %v514_v11, %v513_v10  ;;  %v546_v14 = vld [vmem:[#allocation8 + $0x1f8] sm:$0xff] }
 0x12f   :  { %1575 = vmatprep.subr.bf16.mxu0 %v1574_v17  ;;  %1607 = vmatprep.subr.bf16.mxu1 %v1606_v18  ;;  %v1626_v17 = vpack.c.bf16 %v546_v14, %v545_v12  ;;  %v1596_v18 = vpack.c.bf16 %v498_v16, %v497_v15  ;;  %v872_v10 = vld [vmem:[#allocation7 + $0x298] sm:$0xff]  ;;  %v869_v14 = vld [vmem:[#allocation7 + $0x280] sm:$0xff] }
 0x130   :  { %v876_v11 = vld [vmem:[#allocation7 + $0x2b8] sm:$0xff]  ;;  %v873_v15 = vld [vmem:[#allocation7 + $0x2a0] sm:$0xff] }
 0x132   :  { %1577 = vmatpush3.bf16.msra.mxu0 %v1576_v25  ;;  %1609 = vmatpush3.bf16.msra.mxu1 %v1608_v26  ;;  %v327_v25 = vsub.s32 2, %v2031_v23  ;;  %v315_v26 = vld [vmem:[%s2103_s6] sm:$0xf] }
 0x133   :  { %1579 = vmatprep.subr.bf16.mxu0 %v1578_v29  ;;  %1611 = vmatprep.subr.bf16.mxu1 %v1610_v30  ;;  %v320_v29 = vrot.slane %v315_v26, %v319_v24  ;;  %v324_v31 = vrot.slane %v315_v26, %v323_v27  ;;  %v332_v32 = vrot.slane %v315_v26, %v331_v28  ;;  %v1333_v23 = vld [vmem:[%s2105_s8 + $0x1] ss:$0 sm:$0xff] }
 0x134   :  { %v328_v30 = vrot.slane %v315_v26, %v327_v25  ;;  %v884_v26 = vld [vmem:[#allocation7 + $0x2f8] sm:$0xff] }
 0x136   :  { %1581 = vmatpush3.bf16.msra.mxu0 %v1580_v37  ;;  %1613 = vmatpush3.bf16.msra.mxu1 %v1612_v38 }
 0x137   :  { %1583 = vmatprep.subr.bf16.mxu0 %v1582_v41  ;;  %1615 = vmatprep.subr.bf16.mxu1 %v1614_v42  ;;  %v854_v41 = vld [vmem:[#allocation7 + $0x208] sm:$0xff]  ;;  %v698_v42 = vld [vmem:[#allocation5 + $0x4] sm:$0xf] }
 0x138   :  { %v1630_v56 = vpack.c.bf16 %v858_v43, %v854_v41  ;;  %v889_v41 = vld [vmem:[#allocation7 + $0x320] sm:$0xff] }
 0x13a   :  { %1585 = vmatpush3.bf16.msra.mxu0 %v1584_v49  ;;  %1617 = vmatpush3.bf16.msra.mxu1 %v1616_v50  ;;  %v853_v49 = vld [vmem:[#allocation7 + $0x200] sm:$0xff] }
 0x13b   :  { %1587 = vmatprep.subr.bf16.mxu0 %v1586_v53  ;;  %1619 = vmatprep.subr.bf16.mxu1 %v1618_v54  ;;  %v857_v50 = vld [vmem:[#allocation7 + $0x220] sm:$0xff]  ;;  %v855_v53 = vld [vmem:[#allocation7 + $0x210] sm:$0xff] }
 0x13c   :  { %v859_v54 = vld [vmem:[#allocation7 + $0x230] sm:$0xff] }
 0x13e   :  { %1589 = vmatpush3.bf16.msra.mxu0 %v1588_v61  ;;  %1621 = vmatpush3.bf16.msra.mxu1 %v1620_v62  ;;  %v1632_v61 = vpack.c.bf16 %v857_v50, %v853_v49  ;;  %v1664_v62 = vpack.c.bf16 %v859_v54, %v855_v53  ;;  %v900_v49 = vld [vmem:[#allocation7 + $0x378] sm:$0xff]  ;;  %v893_v54 = vld [vmem:[#allocation7 + $0x340] sm:$0xff] }
 0x13f   :  { %1591 = vmatprep.subr.bf16.mxu0 %v1590_v1  ;;  %1623 = vmatprep.subr.bf16.mxu1 %v1622_v2  ;;  %v865_v1 = vld [vmem:[#allocation7 + $0x260] sm:$0xff]  ;;  %v1634_v2 = vpack.c.bf16 %v866_v58, %v862_v55  ;;  %v899_v58 = vld [vmem:[#allocation7 + $0x370] sm:$0xff] }
 0x140   :  { %v1636_v12 = vpack.c.bf16 %v865_v1, %v861_v63  ;;  %v897_v55 = vld [vmem:[#allocation7 + $0x360] sm:$0xff]  ;;  %v904_v63 = vld [vmem:[#allocation7 + $0x398] sm:$0xff] }
 0x141   :  { %v908_v1 = vld [vmem:[#allocation7 + $0x3b8] sm:$0xff] }
 0x142   :  { %1593 = vmatpush3.bf16.msra.mxu0 %v1592_v8  ;;  %1625 = vmatpush3.bf16.msra.mxu1 %v1624_v9  ;;  %v870_v8 = vld [vmem:[#allocation7 + $0x288] sm:$0xff] }
 0x143   :  { %1595 = vmatprep.subr.bf16.mxu0 %v1594_v13  ;;  %1627 = vmatprep.subr.bf16.mxu1 %v1626_v17  ;;  %v874_v9 = vld [vmem:[#allocation7 + $0x2a8] sm:$0xff]  ;;  %v1668_v13 = vpack.c.bf16 %v867_v7, %v863_v6  ;;  %v1670_v17 = vpack.c.bf16 %v876_v11, %v872_v10  ;;  %v905_v6 = vld [vmem:[#allocation7 + $0x3a0] sm:$0xff]  ;;  %v903_v7 = vld [vmem:[#allocation7 + $0x390] sm:$0xff] }
 0x144   :  { %v1638_v16 = vpack.c.bf16 %v874_v9, %v870_v8  ;;  %v907_v8 = vld [vmem:[#allocation7 + $0x3b0] sm:$0xff]  ;;  %v910_v11 = vld [vmem:[#allocation7 + $0x3c8] sm:$0xff] }
 0x145   :  { %v1688_v10 = vpack.c.bf16 %v907_v8, %v903_v7 }
 0x146   :  { %1597 = vmatpush3.bf16.msra.mxu0 %v1596_v18  ;;  %1629 = vmatpush3.bf16.msra.mxu1 %v1628_v21  ;;  %v871_v18 = vld [vmem:[#allocation7 + $0x290] sm:$0xff]  ;;  %v882_v21 = vld [vmem:[#allocation7 + $0x2e8] sm:$0xff] }
 0x147   :  { %1492 = vmatprep.subr.mxu0 %v1899_v0  ;;  %1497 = vmatprep.subr.mxu1 %v1899_v0 }
 0x1fc   :  { %v403_v33 = vpop.f32.mrb[2].mxu0  ;;  %v474_v34 = vpop.f32.mrb[2].mxu1 }
 0x1fd   :  { %v404_v35 = vadd.f32 %v403_v33, %v320_v29  ;;  %v475_v36 = vadd.f32 %v474_v34, %v328_v30  ;;  %v405_v37 = vpop.f32.mrb[3].mxu0  ;;  %v476_v38 = vpop.f32.mrb[3].mxu1  ;;  %v877_v29 = vld [vmem:[#allocation7 + $0x2c0] sm:$0xff]  ;;  %v879_v33 = vld [vmem:[#allocation7 + $0x2d0] sm:$0xff] }
 0x1fe   :  { %v406_v39 = vadd.f32 %v405_v37, %v324_v31  ;;  %v477_v40 = vadd.f32 %v476_v38, %v332_v32  ;;  %v881_v30 = vld [vmem:[#allocation7 + $0x2e0] sm:$0xff]  ;;  %v1642_v31 = vpack.c.bf16 %v882_v21, %v878_v20  ;;  %v1674_v32 = vpack.c.bf16 %v884_v26, %v880_v22  ;;  %v883_v34 = vld [vmem:[#allocation7 + $0x2f0] sm:$0xff]  ;;  %v888_v37 = vld [vmem:[#allocation7 + $0x318] sm:$0xff] }
 0x1ff   :  { %v479_v51 = vmax.f32 %v404_v35, 0.0  ;;  %v481_v52 = vmax.f32 %v475_v36, 0.0  ;;  %v886_v35 = vld [vmem:[#allocation7 + $0x308] sm:$0xff]  ;;  %v892_v38 = vld [vmem:[#allocation7 + $0x338] sm:$0xff]  ;;  %v911_v20 = vld [vmem:[#allocation7 + $0x3d0] sm:$0xff] }
 0x200   :  { %v480_v46 = vmax.f32 %v406_v39, 0.0  ;;  %v482_v47 = vmax.f32 %v477_v40, 0.0  ;;  %v890_v36 = vld [vmem:[#allocation7 + $0x328] sm:$0xff]  ;;  %v1644_v39 = vpack.c.bf16 %v881_v30, %v877_v29  ;;  %v885_v40 = vld [vmem:[#allocation7 + $0x300] sm:$0xff]  ;;  %v1678_v43 = vpack.c.bf16 %v892_v38, %v888_v37  ;;  %v915_v21 = vld [vmem:[#allocation7 + $0x3f0] sm:$0xff] }
 0x201   :  { %v1648_v50 = vpack.c.bf16 %v889_v41, %v885_v40  ;;  %v1692_v22 = vpack.c.bf16 %v915_v21, %v911_v20  ;;  %v1103_v26 = vld [vmem:[#allocation8 + $0x280] sm:$0xff]  ;;  %v1136_v30 = vld [vmem:[#allocation8 + $0x388] sm:$0xff]  ;;  %v1330_v41 = vld [vmem:[%s2101_s4 + $0x1] ss:$0 sm:$0xff] }
 0x202   :  { %618 = vmatprep.mubr.f32.mxu0 %v480_v46  ;;  %688 = vmatprep.mubr.f32.mxu1 %v482_v47  ;;  %v894_v46 = vld [vmem:[#allocation7 + $0x348] sm:$0xff]  ;;  %v1093_v21 = vld [vmem:[#allocation8 + $0x230] sm:$0xff] }
 0x203   :  { %619 = vmatmul.mubr.f32.vlgmr.msra.gmra.mrb[4].mxu0 %v479_v51  ;;  %689 = vmatmul.mubr.f32.vlgmr.msra.gmra.mrb[4].mxu1 %v481_v52  ;;  %v898_v47 = vld [vmem:[#allocation7 + $0x368] sm:$0xff]  ;;  %v1680_v51 = vpack.c.bf16 %v891_v45, %v887_v44 }
 0x204   :  { %1493 = vmatpush3.msk.msra.mxu0 %vm94_vm1, %v698_v42  ;;  %1498 = vmatpush3.msra.mxu1 %v1325_v48  ;;  %v1646_v42 = vpack.c.bf16 %v890_v36, %v886_v35  ;;  %v896_v48 = vld [vmem:[#allocation7 + $0x358] sm:$0xff]  ;;  %v1650_v52 = vpack.c.bf16 %v898_v47, %v894_v46  ;;  %v1119_v47 = vld [vmem:[#allocation8 + $0x300] sm:$0xff] }
 0x205   :  { %1494 = vmatprep.mubr.msk.f32.mxu0 %vm1900_vm0, %v1899_v0  ;;  %1499 = vmatprep.mubr.msk.f32.mxu1 %vm1900_vm0, %v1899_v0  ;;  %v1682_v53 = vpack.c.bf16 %v900_v49, %v896_v48  ;;  %v1120_v48 = vld [vmem:[#allocation8 + $0x308] sm:$0xff]  ;;  %v1105_v49 = vld [vmem:[#allocation8 + $0x290] sm:$0xff] }
 0x206   :  { %1631 = vmatprep.subr.bf16.mxu0 %v1630_v56  ;;  %1663 = vmatprep.subr.bf16.mxu1 %v1662_v57  ;;  %v895_v56 = vld [vmem:[#allocation7 + $0x350] sm:$0xff]  ;;  %v1652_v57 = vpack.c.bf16 %v897_v55, %v893_v54 }
 0x207   :  { %1495 = vmatmul.mubr.msk.f32.vlgmr.msra.gmra.mrb[6].mxu0 %vm90_vm2, %v2015_v3  ;;  %1500 = vmatmul.mubr.msk.f32.vlgmr.msra.gmra.mrb[6].mxu1 %vm168_vm3, %v2018_v4  ;;  %v1640_v3 = vpack.c.bf16 %v873_v15, %v869_v14  ;;  %v1672_v4 = vpack.c.bf16 %v875_v19, %v871_v18  ;;  %v1684_v59 = vpack.c.bf16 %v899_v58, %v895_v56  ;;  %v916_v15 = vld [vmem:[#allocation7 + $0x3f8] sm:$0xff] }
 0x208   :  { %1633 = vmatpush1.bf16.msra.mxu0 %v1632_v61  ;;  %1665 = vmatpush1.bf16.msra.mxu1 %v1664_v62  ;;  %v906_v61 = vld [vmem:[#allocation7 + $0x3a8] sm:$0xff]  ;;  %v1728_v56 = vpack.c.bf16 %v1120_v48, %v1119_v47  ;;  %v1090_v58 = vld [vmem:[#allocation8 + $0x218] sm:$0xff]  ;;  %v1097_v47 = vld [vmem:[#allocation8 + $0x250] sm:$0xff] }
 0x209   :  { %1635 = vmatprep.subr.bf16.mxu0 %v1634_v2  ;;  %1667 = vmatprep.subr.bf16.mxu1 %v1666_v5  ;;  %v1654_v62 = vpack.c.bf16 %v906_v61, %v902_v60  ;;  %v901_v2 = vld [vmem:[#allocation7 + $0x380] sm:$0xff]  ;;  %v1686_v5 = vpack.c.bf16 %v908_v1, %v904_v63  ;;  %v1122_v63 = vld [vmem:[#allocation8 + $0x318] sm:$0xff] }
 0x20a   :  { %1004 = vmatprep.mubr.f32.mxu0 %v1899_v0  ;;  %1075 = vmatprep.mubr.f32.mxu1 %v1899_v0  ;;  %v1676_v0 = vpack.c.bf16 %v883_v34, %v879_v33  ;;  %v1656_v9 = vpack.c.bf16 %v905_v6, %v901_v2  ;;  %v1324_v34 = vld [vmem:[%s2105_s8] ss:$0 sm:$0xff]  ;;  %v1107_v1 = vld [vmem:[#allocation8 + $0x2a0] sm:$0xff]  ;;  %v1108_v2 = vld [vmem:[#allocation8 + $0x2a8] sm:$0xff] }
 0x20b   :  { %v1140_v6 = vld [vmem:[#allocation8 + $0x3a8] sm:$0xff]  ;;  %v1098_v48 = vld [vmem:[#allocation8 + $0x258] sm:$0xff] }
 0x20c   :  { %1637 = vmatpush1.bf16.msra.mxu0 %v1636_v12  ;;  %1669 = vmatpush1.bf16.msra.mxu1 %v1668_v13  ;;  %v914_v12 = vld [vmem:[#allocation7 + $0x3e8] sm:$0xff]  ;;  %v912_v13 = vld [vmem:[#allocation7 + $0x3d8] sm:$0xff] }
 0x20d   :  { %1639 = vmatprep.subr.bf16.mxu0 %v1638_v16  ;;  %1671 = vmatprep.subr.bf16.mxu1 %v1670_v17  ;;  %v1658_v14 = vpack.c.bf16 %v914_v12, %v910_v11  ;;  %v909_v16 = vld [vmem:[#allocation7 + $0x3c0] sm:$0xff]  ;;  %v1690_v18 = vpack.c.bf16 %v916_v15, %v912_v13  ;;  %v1702_v11 = vpack.c.bf16 %v1108_v2, %v1107_v1  ;;  %v1109_v15 = vld [vmem:[#allocation8 + $0x2b0] sm:$0xff]  ;;  %v1132_v2 = vld [vmem:[#allocation8 + $0x368] sm:$0xff] }
 0x20e   :  { %v913_v17 = vld [vmem:[#allocation7 + $0x3e0] sm:$0xff] }
 0x20f   :  { %v1660_v19 = vpack.c.bf16 %v913_v17, %v909_v16  ;;  %v1123_v13 = vld [vmem:[#allocation8 + $0x320] sm:$0xff]  ;;  %v1110_v16 = vld [vmem:[#allocation8 + $0x2b8] sm:$0xff]  ;;  %v1141_v17 = vld [vmem:[#allocation8 + $0x3b0] sm:$0xff] }
 0x210   :  { %1641 = vmatpush1.bf16.msra.mxu0 %v1640_v3  ;;  %1673 = vmatpush1.bf16.msra.mxu1 %v1672_v4  ;;  %v1104_v3 = vld [vmem:[#allocation8 + $0x288] sm:$0xff]  ;;  %v1135_v4 = vld [vmem:[#allocation8 + $0x380] sm:$0xff] }
 0x211   :  { %1643 = vmatprep.subr.bf16.mxu0 %v1642_v31  ;;  %1675 = vmatprep.subr.bf16.mxu1 %v1674_v32  ;;  %v1694_v29 = vpack.c.bf16 %v1104_v3, %v1103_v26  ;;  %v1726_v31 = vpack.c.bf16 %v1136_v30, %v1135_v4  ;;  %v1706_v26 = vpack.c.bf16 %v1110_v16, %v1109_v15  ;;  %v1125_v4 = vld [vmem:[#allocation8 + $0x330] sm:$0xff]  ;;  %v1111_v30 = vld [vmem:[#allocation8 + $0x2c0] sm:$0xff]  ;;  %v1134_v16 = vld [vmem:[#allocation8 + $0x378] sm:$0xff] }
 0x212   :  { %v1133_v15 = vld [vmem:[#allocation8 + $0x370] sm:$0xff] }
 0x214   :  { %1645 = vmatpush1.bf16.msra.mxu0 %v1644_v39  ;;  %1677 = vmatpush1.bf16.msra.mxu1 %v1676_v0 }
 0x215   :  { %1647 = vmatprep.subr.bf16.mxu0 %v1646_v42  ;;  %1679 = vmatprep.subr.bf16.mxu1 %v1678_v43  ;;  %v1087_v42 = vld [vmem:[#allocation8 + $0x200] sm:$0xff]  ;;  %v1088_v43 = vld [vmem:[#allocation8 + $0x208] sm:$0xff] }
 0x216   :  { %v1696_v55 = vpack.c.bf16 %v1088_v43, %v1087_v42  ;;  %v1114_v42 = vld [vmem:[#allocation8 + $0x2d8] sm:$0xff]  ;;  %v1145_v43 = vld [vmem:[#allocation8 + $0x3d0] sm:$0xff] }
 0x218   :  { %1649 = vmatpush1.bf16.msra.mxu0 %v1648_v50  ;;  %1681 = vmatpush1.bf16.msra.mxu1 %v1680_v51  ;;  %v1106_v51 = vld [vmem:[#allocation8 + $0x298] sm:$0xff] }
 0x219   :  { %1651 = vmatprep.subr.bf16.mxu0 %v1650_v52  ;;  %1683 = vmatprep.subr.bf16.mxu1 %v1682_v53  ;;  %v1137_v52 = vld [vmem:[#allocation8 + $0x390] sm:$0xff]  ;;  %v1138_v53 = vld [vmem:[#allocation8 + $0x398] sm:$0xff]  ;;  %v1698_v60 = vpack.c.bf16 %v1106_v51, %v1105_v49 }
 0x21a   :  { %v1730_v61 = vpack.c.bf16 %v1138_v53, %v1137_v52  ;;  %v1129_v51 = vld [vmem:[#allocation8 + $0x350] sm:$0xff]  ;;  %v1130_v52 = vld [vmem:[#allocation8 + $0x358] sm:$0xff]  ;;  %v1115_v53 = vld [vmem:[#allocation8 + $0x2e0] sm:$0xff] }
 0x21c   :  { %1653 = vmatpush1.bf16.msra.mxu0 %v1652_v57  ;;  %1685 = vmatpush1.bf16.msra.mxu1 %v1684_v59  ;;  %v1089_v57 = vld [vmem:[#allocation8 + $0x210] sm:$0xff] }
 0x21d   :  { %1655 = vmatprep.subr.bf16.mxu0 %v1654_v62  ;;  %1687 = vmatprep.subr.bf16.mxu1 %v1686_v5  ;;  %v1121_v62 = vld [vmem:[#allocation8 + $0x310] sm:$0xff]  ;;  %v1139_v5 = vld [vmem:[#allocation8 + $0x3a0] sm:$0xff]  ;;  %v1700_v7 = vpack.c.bf16 %v1090_v58, %v1089_v57  ;;  %v1716_v57 = vpack.c.bf16 %v1098_v48, %v1097_v47  ;;  %v1748_v58 = vpack.c.bf16 %v1130_v52, %v1129_v51 }
 0x21e   :  { %v1732_v8 = vpack.c.bf16 %v1122_v63, %v1121_v62  ;;  %v1734_v12 = vpack.c.bf16 %v1140_v6, %v1139_v5  ;;  %v1100_v62 = vld [vmem:[#allocation8 + $0x268] sm:$0xff]  ;;  %v1131_v63 = vld [vmem:[#allocation8 + $0x360] sm:$0xff]  ;;  %v1117_v6 = vld [vmem:[#allocation8 + $0x2f0] sm:$0xff] }
 0x21f   :  { %v1752_v5 = vpack.c.bf16 %v1132_v2, %v1131_v63 }
 0x220   :  { %1657 = vmatpush1.bf16.msra.mxu0 %v1656_v9  ;;  %1689 = vmatpush1.bf16.msra.mxu1 %v1688_v10  ;;  %v1091_v9 = vld [vmem:[#allocation8 + $0x220] sm:$0xff]  ;;  %v1092_v10 = vld [vmem:[#allocation8 + $0x228] sm:$0xff] }
 0x221   :  { %1659 = vmatprep.subr.bf16.mxu0 %v1658_v14  ;;  %1691 = vmatprep.subr.bf16.mxu1 %v1690_v18  ;;  %v1124_v14 = vld [vmem:[#allocation8 + $0x328] sm:$0xff]  ;;  %v1142_v18 = vld [vmem:[#allocation8 + $0x3b8] sm:$0xff] }
 0x222   :  { %v1736_v20 = vpack.c.bf16 %v1124_v14, %v1123_v13  ;;  %v1738_v3 = vpack.c.bf16 %v1142_v18, %v1141_v17  ;;  %v1756_v17 = vpack.c.bf16 %v1134_v16, %v1133_v15  ;;  %v1331_v18 = vld [vmem:[%s2103_s6 + $0x4] sm:$0xf] }
 0x224   :  { %1661 = vmatpush1.bf16.msra.mxu0 %v1660_v19  ;;  %1693 = vmatpush1.bf16.msra.mxu1 %v1692_v22  ;;  %v1704_v19 = vpack.c.bf16 %v1092_v10, %v1091_v9  ;;  %v1094_v22 = vld [vmem:[#allocation8 + $0x238] sm:$0xff] }
 0x225   :  { %1695 = vmatprep.subr.bf16.mxu0 %v1694_v29  ;;  %1727 = vmatprep.subr.bf16.mxu1 %v1726_v31  ;;  %v1126_v29 = vld [vmem:[#allocation8 + $0x338] sm:$0xff]  ;;  %v1112_v31 = vld [vmem:[#allocation8 + $0x2c8] sm:$0xff] }
 0x226   :  { %v1150_v10 = vld [vmem:[#allocation8 + $0x3f8] sm:$0xff] }
 0x2d6   :  { %v1370_v32 = vpop.f32.mrb[4].mxu0  ;;  %v1405_v33 = vpop.f32.mrb[4].mxu1 }
 0x2d7   :  { %v1371_v35 = vpop.f32.mrb[5].mxu0  ;;  %v1406_v36 = vpop.f32.mrb[5].mxu1 }
 0x2d8   :  { %v1372_v37 = vadd.f32 %v1371_v35, %v1370_v32  ;;  %v1407_v38 = vadd.f32 %v1406_v36, %v1405_v33  ;;  %v1143_v32 = vld [vmem:[#allocation8 + $0x3c0] sm:$0xff]  ;;  %v1144_v33 = vld [vmem:[#allocation8 + $0x3c8] sm:$0xff]  ;;  %v1740_v35 = vpack.c.bf16 %v1126_v29, %v1125_v4 }
 0x2d9   :  { %v1095_v36 = vld [vmem:[#allocation8 + $0x240] sm:$0xff] }
 0x2da   :  { %v621_v39 = vadd.f32 %v1372_v37, %v1324_v34  ;;  %v768_v0 = vpop.f32.mrb[6].mxu0  ;;  %v838_v40 = vpop.f32.mrb[6].mxu1  ;;  %v1708_v34 = vpack.c.bf16 %v1094_v22, %v1093_v21  ;;  %v1096_v37 = vld [vmem:[#allocation8 + $0x248] sm:$0xff]  ;;  %v927_v21 = vrot.slane %v1331_v18, %v323_v27  ;;  %v935_v22 = vrot.slane %v1331_v18, %v331_v28 }
 0x2db   :  { %v839_v44 = vadd.f32 %v838_v40, %v768_v0  ;;  %v1496_v45 = vpop.f32.mrb[7].mxu0  ;;  %v1501_v46 = vpop.f32.mrb[7].mxu1  ;;  %v1127_v0 = vld [vmem:[#allocation8 + $0x340] sm:$0xff]  ;;  %v1128_v40 = vld [vmem:[#allocation8 + $0x348] sm:$0xff] }
 0x2dc   :  { %v691_v50 = vadd.f32 %v1407_v38, %v621_v39  ;;  %v1710_v38 = vpack.c.bf16 %v1112_v31, %v1111_v30  ;;  %v1742_v39 = vpack.c.bf16 %v1144_v33, %v1143_v32  ;;  %v1712_v45 = vpack.c.bf16 %v1096_v37, %v1095_v36 }
 0x2dd   :  { %v850_v54 = vadd.f32 %v1330_v41, %v839_v44  ;;  %v1113_v41 = vld [vmem:[#allocation8 + $0x2d0] sm:$0xff]  ;;  %v1146_v44 = vld [vmem:[#allocation8 + $0x3d8] sm:$0xff]  ;;  %v1744_v46 = vpack.c.bf16 %v1128_v40, %v1127_v0 }
 0x2de   :  { %694 = vst [vmem:[#allocation10] sm:$0xff] %v691_v50  ;;  %v1714_v49 = vpack.c.bf16 %v1114_v42, %v1113_v41  ;;  %v1746_v50 = vpack.c.bf16 %v1146_v44, %v1145_v43 }
 0x2df   :  { %v851_v59 = vmax.f32 %v850_v54, 0.0  ;;  %v1116_v54 = vld [vmem:[#allocation8 + $0x2e8] sm:$0xff] }
 0x2e1   :  { %1005 = vmatmul.mubr.f32.vlgmr.msra.gmra.mrb[8].mxu0 %v851_v59  ;;  %1076 = vmatmul.mubr.f32.vlgmr.msra.gmra.mrb[8].mxu1 %v851_v59  ;;  %v1718_v59 = vpack.c.bf16 %v1116_v54, %v1115_v53 }
 0x2e2   :  { %1697 = vmatpush3.bf16.msra.mxu0 %v1696_v55  ;;  %1729 = vmatpush3.bf16.msra.mxu1 %v1728_v56  ;;  %v1147_v55 = vld [vmem:[#allocation8 + $0x3e0] sm:$0xff]  ;;  %v1148_v56 = vld [vmem:[#allocation8 + $0x3e8] sm:$0xff] }
 0x2e3   :  { %1699 = vmatprep.subr.bf16.mxu0 %v1698_v60  ;;  %1731 = vmatprep.subr.bf16.mxu1 %v1730_v61  ;;  %v1750_v60 = vpack.c.bf16 %v1148_v56, %v1147_v55  ;;  %v1099_v61 = vld [vmem:[#allocation8 + $0x260] sm:$0xff] }
 0x2e4   :  { %v1720_v1 = vpack.c.bf16 %v1100_v62, %v1099_v61 }
 0x2e6   :  { %1701 = vmatpush3.bf16.msra.mxu0 %v1700_v7  ;;  %1733 = vmatpush3.bf16.msra.mxu1 %v1732_v8  ;;  %v1118_v7 = vld [vmem:[#allocation8 + $0x2f8] sm:$0xff]  ;;  %v1149_v8 = vld [vmem:[#allocation8 + $0x3f0] sm:$0xff] }
 0x2e7   :  { %1703 = vmatprep.subr.bf16.mxu0 %v1702_v11  ;;  %1735 = vmatprep.subr.bf16.mxu1 %v1734_v12  ;;  %v1722_v9 = vpack.c.bf16 %v1118_v7, %v1117_v6  ;;  %v1101_v11 = vld [vmem:[#allocation8 + $0x270] sm:$0xff]  ;;  %v1102_v12 = vld [vmem:[#allocation8 + $0x278] sm:$0xff]  ;;  %v1754_v13 = vpack.c.bf16 %v1150_v10, %v1149_v8 }
 0x2e8   :  { %v1724_v14 = vpack.c.bf16 %v1102_v12, %v1101_v11 }
 0x2ea   :  { %1705 = vmatpush3.bf16.msra.mxu0 %v1704_v19  ;;  %1737 = vmatpush3.bf16.msra.mxu1 %v1736_v20  ;;  %v923_v19 = vrot.slane %v1331_v18, %v319_v24  ;;  %v931_v20 = vrot.slane %v1331_v18, %v327_v25 }
 0x2eb   :  { %1707 = vmatprep.subr.bf16.mxu0 %v1706_v26  ;;  %1739 = vmatprep.subr.bf16.mxu1 %v1738_v3 }
 0x2ee   :  { %1709 = vmatpush3.bf16.msra.mxu0 %v1708_v34  ;;  %1741 = vmatpush3.bf16.msra.mxu1 %v1740_v35 }
 0x2ef   :  { %1711 = vmatprep.subr.bf16.mxu0 %v1710_v38  ;;  %1743 = vmatprep.subr.bf16.mxu1 %v1742_v39 }
 0x2f2   :  { %1713 = vmatpush3.bf16.msra.mxu0 %v1712_v45  ;;  %1745 = vmatpush3.bf16.msra.mxu1 %v1744_v46 }
 0x2f3   :  { %1715 = vmatprep.subr.bf16.mxu0 %v1714_v49  ;;  %1747 = vmatprep.subr.bf16.mxu1 %v1746_v50 }
 0x2f6   :  { %1717 = vmatpush3.bf16.msra.mxu0 %v1716_v57  ;;  %1749 = vmatpush3.bf16.msra.mxu1 %v1748_v58 }
 0x2f7   :  { %1719 = vmatprep.subr.bf16.mxu0 %v1718_v59  ;;  %1751 = vmatprep.subr.bf16.mxu1 %v1750_v60 }
 0x2fa   :  { %1721 = vmatpush3.bf16.msra.mxu0 %v1720_v1  ;;  %1753 = vmatpush3.bf16.msra.mxu1 %v1752_v5 }
 0x2fb   :  { %1723 = vmatprep.subr.bf16.mxu0 %v1722_v9  ;;  %1755 = vmatprep.subr.bf16.mxu1 %v1754_v13 }
 0x2fe   :  { %1725 = vmatpush3.bf16.msra.mxu0 %v1724_v14  ;;  %1757 = vmatpush3.bf16.msra.mxu1 %v1756_v17 }
 0x3b4   :  { %v1006_v26 = vpop.f32.mrb[8].mxu0  ;;  %v1077_v3 = vpop.f32.mrb[8].mxu1 }
 0x3b5   :  { %v1007_v4 = vadd.f32 %v1006_v26, %v923_v19  ;;  %v1078_v29 = vadd.f32 %v1077_v3, %v931_v20  ;;  %v1008_v30 = vpop.f32.mrb[9].mxu0  ;;  %v1079_v31 = vpop.f32.mrb[9].mxu1 }
 0x3b6   :  { %v1009_v32 = vadd.f32 %v1008_v30, %v927_v21  ;;  %v1080_v33 = vadd.f32 %v1079_v31, %v935_v22 }
 0x3b7   :  { %v1082_v24 = vmax.f32 %v1007_v4, 0.0  ;;  %v1084_v36 = vmax.f32 %v1078_v29, 0.0 }
 0x3b8   :  { %v1083_v34 = vmax.f32 %v1009_v32, 0.0  ;;  %v1085_v35 = vmax.f32 %v1080_v33, 0.0 }
 0x3ba   :  { %1223 = vmatprep.mubr.f32.mxu0 %v1083_v34  ;;  %1293 = vmatprep.mubr.f32.mxu1 %v1085_v35 }
 0x3bb   :  { %1224 = vmatmul.mubr.f32.vlgmr.msra.gmra.mrb[10].mxu0 %v1082_v24  ;;  %1294 = vmatmul.mubr.f32.vlgmr.msra.gmra.mrb[10].mxu1 %v1084_v36 }
 0x48e   :  { %v1444_v25 = vpop.f32.mrb[10].mxu0  ;;  %v1479_v27 = vpop.f32.mrb[10].mxu1 }
 0x48f   :  { %v1445_v28 = vpop.f32.mrb[11].mxu0  ;;  %v1480_v37 = vpop.f32.mrb[11].mxu1 }
 0x490   :  { %v1446_v38 = vadd.f32 %v1445_v28, %v1444_v25  ;;  %v1481_v39 = vadd.f32 %v1480_v37, %v1479_v27 }
 0x492   :  { %v1226_v0 = vadd.f32 %v1446_v38, %v1333_v23 }
 0x494   :  { %v1296_v40 = vadd.f32 %v1481_v39, %v1226_v0 }
 0x496   :  { %1300 = vst [vmem:[#allocation10 + $0x8] sm:$0xff] %v1296_v40 }
 0x497   :  { %1870 = shalt.err (!%p1867_p8)
}
 0x498   :  { %s1871_s8 = scalar_lea.hbm %s2106_s9, 256 }
 0x499   :  { %p1872_p9 = scmp.ne.s32.totalorder %s2106_s9, %s1871_s8  ;;  %p1875_p10 = scmp.lt.u32.totalorder %s1871_s8, %s2106_s9 }
 0x49b   :  { %p1877_p11 = pnand %p1875_p10, %p1872_p9 }
 0x49d   :  { %1880 = shalt.err (!%p1877_p11)
}
 0x49e   :  { %1312 = dma.vmem_to_hbm [thread:$0]  %s1307_s11, 256, %s2106_s9, [#allocation4], %s1897_s5, %s1897_s5, %s1898_s26  }
 0x49f   :  { %1887 = dma.done.wait [#allocation4], 256  }
 0x4a0   :  { %1888 = vsyncadd [#allocation4], 4294967040 }
 0x4a1   :  { %1316 = vsyncpa [#allocation3], 1 }
 0x4a2   :  { %1317 = vsyncpa [#allocation6], 1 }
 0x4a3   :  { %1318 = vsyncpa [#allocation9], 1 }
 0x4a4   :  { %1319 = vsyncpa [#allocation4], 1 }

</bundles_post_ra>
